<compile_context>
chip_gen: v5e
topology: v5e:2x2
jax: 0.10.0
libtpu: 0.0.40
codegen_flags: <defaults>
</compile_context>

<pallas_src>
import functools

import jax
import jax.numpy as jnp
from jax.experimental import pallas as pl
from jax.experimental.pallas import tpu as pltpu

HIDDEN = 256


# -----------------------------------------------------------------------------
# Kernel
# -----------------------------------------------------------------------------
def _critic_kernel(
    sa_ref,                            # (TB, in_dim) f32, concatenated [state||action]
    w1_ref, b1_ref,                    # fused layer-1 (both heads): (in_dim, 2H), (1, 2H)
    w2a_ref, b2a_ref,                  # layer-2, Q1 head
    w2b_ref, b2b_ref,                  # layer-2, Q2 head
    w3a_ref, w3b_ref,                  # layer-3 weight rows: (1, H) f32 each
    b3a_ref, b3b_ref,                  # layer-3 biases: (1, 1) f32 each
    q_ref,                             # (TB, 128): lane 0 = q1, lane 1 = q2
    *, hidden,
):
    bf16 = jnp.bfloat16
    sa = sa_ref[...].astype(bf16)

    # Layer 1 for both heads: a single MXU dot on the concatenated input.
    h = jnp.dot(sa, w1_ref[...], preferred_element_type=jnp.float32) + b1_ref[...]
    h = jnp.maximum(h, 0.0)  # (TB, 2H) f32

    # Layer 2: one dot per head (lane slices of h are 256-aligned).
    h1 = jnp.dot(h[:, :hidden].astype(bf16), w2a_ref[...],
                 preferred_element_type=jnp.float32) + b2a_ref[...]
    h1 = jnp.maximum(h1, 0.0)
    h2 = jnp.dot(h[:, hidden:].astype(bf16), w2b_ref[...],
                 preferred_element_type=jnp.float32) + b2b_ref[...]
    h2 = jnp.maximum(h2, 0.0)

    # Layer 3 off the MXU: VPU multiply + lane reduce per head (an N=1 MXU dot
    # would pay a full vmatmul push set for almost no useful work).
    q1 = jnp.sum(h1 * w3a_ref[...], axis=-1, keepdims=True) + b3a_ref[...]  # (TB, 1)
    q2 = jnp.sum(h2 * w3b_ref[...], axis=-1, keepdims=True) + b3b_ref[...]  # (TB, 1)

    # Lane-dense output store: q1 -> lane 0, q2 -> lane 1, zeros elsewhere.
    lane = jax.lax.broadcasted_iota(jnp.int32, q_ref.shape, 1)
    q_ref[...] = jnp.where(lane == 0, q1, jnp.where(lane == 1, q2, 0.0))


# -----------------------------------------------------------------------------
# Wrapper
# -----------------------------------------------------------------------------
def pack_params(p, hidden=HIDDEN):
    """Build fused / bf16 kernel parameters from per-head f32 params."""
    bf16 = jnp.bfloat16
    return dict(
        w1=jnp.concatenate([p["w1_q1"], p["w1_q2"]], axis=1).astype(bf16),  # (in_dim, 2H)
        b1=jnp.concatenate([p["b1_q1"], p["b1_q2"]], axis=1),               # (1, 2H) f32
        w2_q1=p["w2_q1"].astype(bf16), b2_q1=p["b2_q1"],
        w2_q2=p["w2_q2"].astype(bf16), b2_q2=p["b2_q2"],
        w3_q1=p["w3_q1"].T,                                                 # (1, H) f32
        w3_q2=p["w3_q2"].T,                                                 # (1, H) f32
        b3_q1=p["b3_q1"],                                                   # (1, 1) f32
        b3_q2=p["b3_q2"],                                                   # (1, 1) f32
    )


def critic_forward(state, action, kp, hidden=HIDDEN, tb_max=1024):
    """Pallas equivalent of Critic.forward(state, action) -> (q1, q2)."""
    if state.ndim == 1:
        state = state[None, :]
    if action.ndim == 1:
        action = action[None, :]
    sa = jnp.concatenate(
        [state.astype(jnp.float32), action.astype(jnp.float32)], axis=1)
    B, in_dim = sa.shape

    # Batch tile: aim for >=2 grid steps (both v7x TensorCores busy), keep the
    # tile a multiple of 8, cap it, and pad the batch minimally.
    half = -(-B // 2)
    tb = max(8, min(tb_max, ((half + 7) // 8) * 8))
    bp = ((B + tb - 1) // tb) * tb
    if bp != B:
        sa = jnp.pad(sa, ((0, bp - B), (0, 0)))

    grid = (bp // tb,)

    def const(arr):
        nd = arr.ndim
        return pl.BlockSpec(arr.shape, lambda i, nd=nd: (0,) * nd)

    # Advisory cost estimate (lets XLA overlap this small call with neighbors).
    flops = 2 * bp * (in_dim * 2 * hidden + 2 * hidden * hidden) + 4 * bp * hidden
    weight_bytes = (
        (kp["w1"].size + kp["w2_q1"].size + kp["w2_q2"].size) * 2      # bf16
        + (kp["b1"].size + kp["b2_q1"].size + kp["b2_q2"].size
           + kp["w3_q1"].size + kp["w3_q2"].size + 2) * 4              # f32
    )
    bytes_accessed = weight_bytes + bp * in_dim * 4 + bp * 128 * 4

    kernel = functools.partial(_critic_kernel, hidden=hidden)

    q = pl.pallas_call(
        kernel,
        out_shape=jax.ShapeDtypeStruct((bp, 128), jnp.float32),
        grid=grid,
        in_specs=[
            pl.BlockSpec((tb, in_dim), lambda i: (i, 0)),
            const(kp["w1"]), const(kp["b1"]),
            const(kp["w2_q1"]), const(kp["b2_q1"]),
            const(kp["w2_q2"]), const(kp["b2_q2"]),
            const(kp["w3_q1"]), const(kp["w3_q2"]),
            const(kp["b3_q1"]), const(kp["b3_q2"]),
        ],
        out_specs=pl.BlockSpec((tb, 128), lambda i: (i, 0)),
        compiler_params=pltpu.CompilerParams(dimension_semantics=("parallel",)),
        cost_estimate=pl.CostEstimate(
            flops=flops, transcendentals=0, bytes_accessed=bytes_accessed),
    )(
        sa,
        kp["w1"], kp["b1"],
        kp["w2_q1"], kp["b2_q1"],
        kp["w2_q2"], kp["b2_q2"],
        kp["w3_q1"], kp["w3_q2"],
        kp["b3_q1"], kp["b3_q2"],
    )
    # Padded rows [B:bp] hold garbage-by-design (relu(b1)-driven); slice first.
    q1 = q[:B, 0:1]
    q2 = q[:B, 1:2]
    return q1, q2


# -----------------------------------------------------------------------------
# Deterministic parameter initialization (shapes from Critic.__init__)
# -----------------------------------------------------------------------------
def init_params(key, state_dim, action_dim, hidden=HIDDEN):
    in_dim = state_dim + action_dim
    ks = jax.random.split(key, 12)

    def linear(kw, kb, fan_in, fan_out):
        # PyTorch-style uniform(-1/sqrt(fan_in), 1/sqrt(fan_in)); W stored (in, out).
        bound = 1.0 / jnp.sqrt(jnp.float32(fan_in))
        w = jax.random.uniform(kw, (fan_in, fan_out), jnp.float32, -bound, bound)
        b = jax.random.uniform(kb, (1, fan_out), jnp.float32, -bound, bound)
        return w, b

    w1a, b1a = linear(ks[0], ks[1], in_dim, hidden)
    w2a, b2a = linear(ks[2], ks[3], hidden, hidden)
    w3a, b3a = linear(ks[4], ks[5], hidden, 1)
    w1b, b1b = linear(ks[6], ks[7], in_dim, hidden)
    w2b, b2b = linear(ks[8], ks[9], hidden, hidden)
    w3b, b3b = linear(ks[10], ks[11], hidden, 1)

    return dict(
        w1_q1=w1a, b1_q1=b1a, w2_q1=w2a, b2_q1=b2a, w3_q1=w3a, b3_q1=b3a,
        w1_q2=w1b, b1_q2=b1b, w2_q2=w2b, b2_q2=b2b, w3_q2=w3b, b3_q2=b3b,
    )


# -----------------------------------------------------------------------------
# References
# -----------------------------------------------------------------------------
def critic_forward_ref_bf16(state, action, p):
    """Plain-JAX reference matching the kernel's numerics (bf16 L1/L2, f32 L3)."""
    bf16 = jnp.bfloat16

    def lin(x, w, b):
        return jnp.dot(x.astype(bf16), w.astype(bf16),
                       preferred_element_type=jnp.float32) + b

    sa = jnp.concatenate([state, action], axis=1)
    h1 = jnp.maximum(lin(sa, p["w1_q1"], p["b1_q1"]), 0.0)
    h1 = jnp.maximum(lin(h1, p["w2_q1"], p["b2_q1"]), 0.0)
    q1 = jnp.dot(h1, p["w3_q1"]) + p["b3_q1"]
    h2 = jnp.maximum(lin(sa, p["w1_q2"], p["b1_q2"]), 0.0)
    h2 = jnp.maximum(lin(h2, p["w2_q2"], p["b2_q2"]), 0.0)
    q2 = jnp.dot(h2, p["w3_q2"]) + p["b3_q2"]
    return q1, q2


def critic_forward_ref_f32(state, action, p):
    """Full-f32 reference (matches the original PyTorch module's math)."""
    sa = jnp.concatenate([state, action], axis=1)
    h1 = jnp.maximum(sa @ p["w1_q1"] + p["b1_q1"], 0.0)
    h1 = jnp.maximum(h1 @ p["w2_q1"] + p["b2_q1"], 0.0)
    q1 = h1 @ p["w3_q1"] + p["b3_q1"]
    h2 = jnp.maximum(sa @ p["w1_q2"] + p["b1_q2"], 0.0)
    h2 = jnp.maximum(h2 @ p["w2_q2"] + p["b2_q2"], 0.0)
    q2 = h2 @ p["w3_q2"] + p["b3_q2"]
    return q1, q2


if __name__ == "__main__":
    key = jax.random.PRNGKey(0)
    k_param, k_state, k_action = jax.random.split(key, 3)

    B, state_dim, action_dim = 8, 12, 4
    params = init_params(k_param, state_dim, action_dim)
    kparams = pack_params(params)

    state = jax.random.normal(k_state, (B, state_dim), jnp.float32)
    action = jax.random.normal(k_action, (B, action_dim), jnp.float32)

    q1, q2 = critic_forward(state, action, kparams)
    q1 = jax.block_until_ready(q1)
    q2 = jax.block_until_ready(q2)

    q1_b, q2_b = critic_forward_ref_bf16(state, action, params)
    q1_f, q2_f = critic_forward_ref_f32(state, action, params)

    assert q1.shape == (B, 1) and q2.shape == (B, 1)
    # Tight check vs. matched-numerics (bf16-weight) reference.
    assert jnp.allclose(q1, q1_b, atol=2e-3, rtol=2e-3)
    assert jnp.allclose(q2, q2_b, atol=2e-3, rtol=2e-3)
    # Loose sanity check vs. the full-f32 PyTorch-equivalent math.
    assert jnp.allclose(q1, q1_f, atol=5e-2, rtol=5e-2)
    assert jnp.allclose(q2, q2_f, atol=5e-2, rtol=5e-2)

    print("KERNEL_OK")
</pallas_src>

<mosaic_0001>
module attributes {stable_mosaic.version = 11 : i64} {
  func.func @_critic_kernel(%arg0: i32, %arg1: memref<8x16xf32, #tpu.memory_space<vmem>>, %arg2: memref<16x512xbf16, #tpu.memory_space<vmem>>, %arg3: memref<1x512xf32, #tpu.memory_space<vmem>>, %arg4: memref<256x256xbf16, #tpu.memory_space<vmem>>, %arg5: memref<1x256xf32, #tpu.memory_space<vmem>>, %arg6: memref<256x256xbf16, #tpu.memory_space<vmem>>, %arg7: memref<1x256xf32, #tpu.memory_space<vmem>>, %arg8: memref<1x256xf32, #tpu.memory_space<vmem>>, %arg9: memref<1x256xf32, #tpu.memory_space<vmem>>, %arg10: memref<1x1xf32, #tpu.memory_space<vmem>>, %arg11: memref<1x1xf32, #tpu.memory_space<vmem>>, %arg12: memref<8x128xf32, #tpu.memory_space<vmem>>) attributes {dimension_semantics = [#tpu.dimension_semantics<parallel>], iteration_bounds = array<i64: 1>, scalar_prefetch = 0 : i64, scratch_operands = 0 : i64, tpu.core_type = #tpu.core_type<tc>, window_params = [{transform_indices = @transform_0, window_bounds = array<i64: 8, 16>}, {pipeline_mode = #tpu.pipeline_mode<synchronous>, transform_indices = @transform_1, window_bounds = array<i64: 16, 512>}, {pipeline_mode = #tpu.pipeline_mode<synchronous>, transform_indices = @transform_2, window_bounds = array<i64: 1, 512>}, {pipeline_mode = #tpu.pipeline_mode<synchronous>, transform_indices = @transform_3, window_bounds = array<i64: 256, 256>}, {pipeline_mode = #tpu.pipeline_mode<synchronous>, transform_indices = @transform_4, window_bounds = array<i64: 1, 256>}, {pipeline_mode = #tpu.pipeline_mode<synchronous>, transform_indices = @transform_5, window_bounds = array<i64: 256, 256>}, {pipeline_mode = #tpu.pipeline_mode<synchronous>, transform_indices = @transform_6, window_bounds = array<i64: 1, 256>}, {pipeline_mode = #tpu.pipeline_mode<synchronous>, transform_indices = @transform_7, window_bounds = array<i64: 1, 256>}, {pipeline_mode = #tpu.pipeline_mode<synchronous>, transform_indices = @transform_8, window_bounds = array<i64: 1, 256>}, {pipeline_mode = #tpu.pipeline_mode<synchronous>, transform_indices = @transform_9, window_bounds = array<i64: 1, 1>}, {pipeline_mode = #tpu.pipeline_mode<synchronous>, transform_indices = @transform_10, window_bounds = array<i64: 1, 1>}, {transform_indices = @transform_11, window_bounds = array<i64: 8, 128>}]} {
    %c0 = arith.constant 0 : index
    %c0_0 = arith.constant 0 : index
    %0 = vector.load %arg1[%c0, %c0_0] : memref<8x16xf32, #tpu.memory_space<vmem>>, vector<8x16xf32>
    %1 = arith.truncf %0 : vector<8x16xf32> to vector<8x16xbf16>
    %c0_1 = arith.constant 0 : index
    %c0_2 = arith.constant 0 : index
    %2 = vector.load %arg2[%c0_1, %c0_2] : memref<16x512xbf16, #tpu.memory_space<vmem>>, vector<16x512xbf16>
    %cst = arith.constant dense<0.000000e+00> : vector<8x512xf32>
    %3 = tpu.matmul %1, %2, %cst {dimension_numbers = #tpu.dot_dimension_numbers<[1], [0], [0], [1], [0, 0, 1, 1], [], []>} : vector<8x16xbf16>, vector<16x512xbf16>, vector<8x512xf32> -> vector<8x512xf32>
    %c0_3 = arith.constant 0 : index
    %c0_4 = arith.constant 0 : index
    %4 = vector.load %arg3[%c0_3, %c0_4] : memref<1x512xf32, #tpu.memory_space<vmem>>, vector<1x512xf32>
    %5 = vector.broadcast %4 : vector<1x512xf32> to vector<8x512xf32>
    %6 = arith.addf %3, %5 : vector<8x512xf32>
    %cst_5 = arith.constant 0.000000e+00 : f32
    %7 = vector.broadcast %cst_5 : f32 to vector<8x512xf32>
    %8 = arith.maximumf %6, %7 : vector<8x512xf32>
    %9 = vector.extract_strided_slice %8 {offsets = [0, 0], sizes = [8, 256], strides = [1, 1]} : vector<8x512xf32> to vector<8x256xf32>
    %10 = arith.truncf %9 : vector<8x256xf32> to vector<8x256xbf16>
    %c0_6 = arith.constant 0 : index
    %c0_7 = arith.constant 0 : index
    %11 = vector.load %arg4[%c0_6, %c0_7] : memref<256x256xbf16, #tpu.memory_space<vmem>>, vector<256x256xbf16>
    %cst_8 = arith.constant dense<0.000000e+00> : vector<8x256xf32>
    %12 = tpu.matmul %10, %11, %cst_8 {dimension_numbers = #tpu.dot_dimension_numbers<[1], [0], [0], [1], [0, 0, 1, 1], [], []>} : vector<8x256xbf16>, vector<256x256xbf16>, vector<8x256xf32> -> vector<8x256xf32>
    %c0_9 = arith.constant 0 : index
    %c0_10 = arith.constant 0 : index
    %13 = vector.load %arg5[%c0_9, %c0_10] : memref<1x256xf32, #tpu.memory_space<vmem>>, vector<1x256xf32>
    %14 = vector.broadcast %13 : vector<1x256xf32> to vector<8x256xf32>
    %15 = arith.addf %12, %14 : vector<8x256xf32>
    %cst_11 = arith.constant 0.000000e+00 : f32
    %16 = vector.broadcast %cst_11 : f32 to vector<8x256xf32>
    %17 = arith.maximumf %15, %16 : vector<8x256xf32>
    %18 = vector.extract_strided_slice %8 {offsets = [0, 256], sizes = [8, 256], strides = [1, 1]} : vector<8x512xf32> to vector<8x256xf32>
    %19 = arith.truncf %18 : vector<8x256xf32> to vector<8x256xbf16>
    %c0_12 = arith.constant 0 : index
    %c0_13 = arith.constant 0 : index
    %20 = vector.load %arg6[%c0_12, %c0_13] : memref<256x256xbf16, #tpu.memory_space<vmem>>, vector<256x256xbf16>
    %cst_14 = arith.constant dense<0.000000e+00> : vector<8x256xf32>
    %21 = tpu.matmul %19, %20, %cst_14 {dimension_numbers = #tpu.dot_dimension_numbers<[1], [0], [0], [1], [0, 0, 1, 1], [], []>} : vector<8x256xbf16>, vector<256x256xbf16>, vector<8x256xf32> -> vector<8x256xf32>
    %c0_15 = arith.constant 0 : index
    %c0_16 = arith.constant 0 : index
    %22 = vector.load %arg7[%c0_15, %c0_16] : memref<1x256xf32, #tpu.memory_space<vmem>>, vector<1x256xf32>
    %23 = vector.broadcast %22 : vector<1x256xf32> to vector<8x256xf32>
    %24 = arith.addf %21, %23 : vector<8x256xf32>
    %cst_17 = arith.constant 0.000000e+00 : f32
    %25 = vector.broadcast %cst_17 : f32 to vector<8x256xf32>
    %26 = arith.maximumf %24, %25 : vector<8x256xf32>
    %c0_18 = arith.constant 0 : index
    %c0_19 = arith.constant 0 : index
    %27 = vector.load %arg8[%c0_18, %c0_19] : memref<1x256xf32, #tpu.memory_space<vmem>>, vector<1x256xf32>
    %28 = vector.broadcast %27 : vector<1x256xf32> to vector<8x256xf32>
    %29 = arith.mulf %17, %28 : vector<8x256xf32>
    %cst_20 = arith.constant dense<0.000000e+00> : vector<8xf32>
    %30 = vector.multi_reduction <add>, %29, %cst_20 [1] : vector<8x256xf32> to vector<8xf32>
    %31 = vector.shape_cast %30 : vector<8xf32> to vector<8x1xf32>
    %c0_21 = arith.constant 0 : index
    %c0_22 = arith.constant 0 : index
    %32 = vector.load %arg10[%c0_21, %c0_22] : memref<1x1xf32, #tpu.memory_space<vmem>>, vector<1x1xf32>
    %33 = vector.broadcast %32 : vector<1x1xf32> to vector<8x1xf32>
    %34 = arith.addf %31, %33 : vector<8x1xf32>
    %c0_23 = arith.constant 0 : index
    %c0_24 = arith.constant 0 : index
    %35 = vector.load %arg9[%c0_23, %c0_24] : memref<1x256xf32, #tpu.memory_space<vmem>>, vector<1x256xf32>
    %36 = vector.broadcast %35 : vector<1x256xf32> to vector<8x256xf32>
    %37 = arith.mulf %26, %36 : vector<8x256xf32>
    %cst_25 = arith.constant dense<0.000000e+00> : vector<8xf32>
    %38 = vector.multi_reduction <add>, %37, %cst_25 [1] : vector<8x256xf32> to vector<8xf32>
    %39 = vector.shape_cast %38 : vector<8xf32> to vector<8x1xf32>
    %c0_26 = arith.constant 0 : index
    %c0_27 = arith.constant 0 : index
    %40 = vector.load %arg11[%c0_26, %c0_27] : memref<1x1xf32, #tpu.memory_space<vmem>>, vector<1x1xf32>
    %41 = vector.broadcast %40 : vector<1x1xf32> to vector<8x1xf32>
    %42 = arith.addf %39, %41 : vector<8x1xf32>
    %43 = tpu.iota {dimensions = array<i32: 1>} : vector<8x128xi32>
    %c0_i32 = arith.constant 0 : i32
    %44 = vector.broadcast %c0_i32 : i32 to vector<8x128xi32>
    %45 = arith.cmpi eq, %43, %44 : vector<8x128xi32>
    %c1_i32 = arith.constant 1 : i32
    %46 = vector.broadcast %c1_i32 : i32 to vector<8x128xi32>
    %47 = arith.cmpi eq, %43, %46 : vector<8x128xi32>
    %cst_28 = arith.constant 0.000000e+00 : f32
    %48 = vector.shape_cast %42 : vector<8x1xf32> to vector<8x1xf32>
    %49 = vector.broadcast %48 : vector<8x1xf32> to vector<8x128xf32>
    %50 = vector.broadcast %cst_28 : f32 to vector<8x128xf32>
    %51 = arith.select %47, %49, %50 : vector<8x128xi1>, vector<8x128xf32>
    %52 = vector.shape_cast %34 : vector<8x1xf32> to vector<8x1xf32>
    %53 = vector.broadcast %52 : vector<8x1xf32> to vector<8x128xf32>
    %54 = arith.select %45, %53, %51 : vector<8x128xi1>, vector<8x128xf32>
    %c0_29 = arith.constant 0 : index
    %c0_30 = arith.constant 0 : index
    %55 = vector.load %arg12[%c0_29, %c0_30] : memref<8x128xf32, #tpu.memory_space<vmem>>, vector<8x128xf32>
    tpu.vector_store %arg12[%c0_29, %c0_30], %54 {strides = array<i32>} : memref<8x128xf32, #tpu.memory_space<vmem>>, vector<8x128xf32>,
    return
  }
  func.func @transform_0(%arg0: i32) -> (i32, i32) {
    %c0_i32 = arith.constant 0 : i32
    %c0_i32_0 = arith.constant 0 : i32
    return %arg0, %c0_i32 : i32, i32
  }
  func.func @transform_1(%arg0: i32) -> (i32, i32) {
    %c0_i32 = arith.constant 0 : i32
    %c0_i32_0 = arith.constant 0 : i32
    %c0_i32_1 = arith.constant 0 : i32
    return %c0_i32, %c0_i32_0 : i32, i32
  }
  func.func @transform_2(%arg0: i32) -> (i32, i32) {
    %c0_i32 = arith.constant 0 : i32
    %c0_i32_0 = arith.constant 0 : i32
    %c0_i32_1 = arith.constant 0 : i32
    return %c0_i32, %c0_i32_0 : i32, i32
  }
  func.func @transform_3(%arg0: i32) -> (i32, i32) {
    %c0_i32 = arith.constant 0 : i32
    %c0_i32_0 = arith.constant 0 : i32
    %c0_i32_1 = arith.constant 0 : i32
    return %c0_i32, %c0_i32_0 : i32, i32
  }
  func.func @transform_4(%arg0: i32) -> (i32, i32) {
    %c0_i32 = arith.constant 0 : i32
    %c0_i32_0 = arith.constant 0 : i32
    %c0_i32_1 = arith.constant 0 : i32
    return %c0_i32, %c0_i32_0 : i32, i32
  }
  func.func @transform_5(%arg0: i32) -> (i32, i32) {
    %c0_i32 = arith.constant 0 : i32
    %c0_i32_0 = arith.constant 0 : i32
    %c0_i32_1 = arith.constant 0 : i32
    return %c0_i32, %c0_i32_0 : i32, i32
  }
  func.func @transform_6(%arg0: i32) -> (i32, i32) {
    %c0_i32 = arith.constant 0 : i32
    %c0_i32_0 = arith.constant 0 : i32
    %c0_i32_1 = arith.constant 0 : i32
    return %c0_i32, %c0_i32_0 : i32, i32
  }
  func.func @transform_7(%arg0: i32) -> (i32, i32) {
    %c0_i32 = arith.constant 0 : i32
    %c0_i32_0 = arith.constant 0 : i32
    %c0_i32_1 = arith.constant 0 : i32
    return %c0_i32, %c0_i32_0 : i32, i32
  }
  func.func @transform_8(%arg0: i32) -> (i32, i32) {
    %c0_i32 = arith.constant 0 : i32
    %c0_i32_0 = arith.constant 0 : i32
    %c0_i32_1 = arith.constant 0 : i32
    return %c0_i32, %c0_i32_0 : i32, i32
  }
  func.func @transform_9(%arg0: i32) -> (i32, i32) {
    %c0_i32 = arith.constant 0 : i32
    %c0_i32_0 = arith.constant 0 : i32
    %c0_i32_1 = arith.constant 0 : i32
    return %c0_i32, %c0_i32_0 : i32, i32
  }
  func.func @transform_10(%arg0: i32) -> (i32, i32) {
    %c0_i32 = arith.constant 0 : i32
    %c0_i32_0 = arith.constant 0 : i32
    %c0_i32_1 = arith.constant 0 : i32
    return %c0_i32, %c0_i32_0 : i32, i32
  }
  func.func @transform_11(%arg0: i32) -> (i32, i32) {
    %c0_i32 = arith.constant 0 : i32
    %c0_i32_0 = arith.constant 0 : i32
    return %arg0, %c0_i32 : i32, i32
  }
}

</mosaic_0001>

<bundles_post_ra>
// kernel: tpu_custom_call.1
= control target key start
LH: loop header
LB: loop body
LE: loop exit
PB: predicated region body
PF: predicated region fallthrough
CT: control target
= control target key end

     0   :  { %s1412_s0 = inlined_call_operand.hbm [shape: f32[8,16], index: 0, kind: input, shape index: {}]   ;;  %s1413_s1 = inlined_call_operand.hbm [shape: bf16[16,512], index: 1, kind: input, shape index: {}]   ;;  %s1414_s2 = inlined_call_operand.vmem [shape: f32[1,512], index: 2, kind: input, shape index: {}]   ;;  %s1415_s3 = inlined_call_operand.hbm [shape: bf16[256,256], index: 3, kind: input, shape index: {}]   ;;  %s1416_s4 = inlined_call_operand.vmem [shape: f32[1,256], index: 4, kind: input, shape index: {}]   ;;  %s1417_s5 = inlined_call_operand.hbm [shape: bf16[256,256], index: 5, kind: input, shape index: {}]   ;;  %s1418_s6 = inlined_call_operand.vmem [shape: f32[1,256], index: 6, kind: input, shape index: {}]   ;;  %s1419_s7 = inlined_call_operand.vmem [shape: f32[1,256], index: 7, kind: input, shape index: {}]   ;;  %s1420_s8 = inlined_call_operand.hbm [shape: f32[1,256], index: 8, kind: input, shape index: {}]   ;;  %s1421_s9 = inlined_call_operand.<no memory space> [shape: f32[1,1], index: 9, kind: input, shape index: {}]   ;;  %s1422_s11 = inlined_call_operand.hbm [shape: f32[8,128], index: 11, kind: output, shape index: {}]   ;;  %s1423_s10 = inlined_call_operand.<no memory space> [shape: f32[1,1], index: 10, kind: input, shape index: {}]  }
   0x1   :  { %v16_v0 = vstv %s1421_s9  ;;  %v18_v1 = vstv %s1423_s10 }
   0x2   :  { %17 = vst [vmem:[#allocation2] sm:$0x1] %v16_v0 }
   0x3   :  { %19 = vst [vmem:[#allocation3] sm:$0x1] %v18_v1 }
   0x4   :  { %20 = vsyncpa [#allocation5], 0 }
   0x5   :  { %21 = vsyncpa [#allocation8], 0 }
   0x6   :  { %22 = vsyncpa [#allocation11], 0  ;;  %s39_s23 = sshll.u32 %s1413_s1, 4  ;;  %s40_s23 = int_to_ptr.hbm [resolvable:$true] %s39_s23 }
   0x7   :  { %23 = vsyncpa [#allocation6], 0  ;;  %s1301_s24 = smov [#allocation7]   ;;  %s1302_s26 = smov 256  }
   0x8   :  { %s41_s25 = sshll.u32 %s1301_s24, 4  ;;  %s1303_s9 = smov 16   ;;  %s42_s25 = int_to_ptr.vmem [resolvable:$true] %s41_s25 }
   0x9   :  { %47 = dma.hbm_to_vmem [thread:$0]  %s40_s23, 512, %s42_s25, [#allocation8], %s1302_s26, %s1302_s26, %s1303_s9  }
   0xa   :  { %s69_s10 = sshll.u32 %s1417_s5, 4  ;;  %s1304_s29 = smov [#allocation10]   ;;  %s70_s10 = int_to_ptr.hbm [resolvable:$true] %s69_s10 }
   0xb   :  { %s71_s30 = sshll.u32 %s1304_s29, 4  ;;  %s29_s14 = sshll.u32 %s1412_s0, 4  ;;  %s72_s30 = int_to_ptr.vmem [resolvable:$true] %s71_s30  ;;  %s30_s14 = int_to_ptr.hbm [resolvable:$true] %s29_s14 }
   0xc   :  { %s1305_s1 = smov 128   ;;  %s1306_s15 = smov 8  }
   0xd   :  { %77 = dma.hbm_to_vmem [thread:$0]  %s70_s10, 4096, %s72_s30, [#allocation11], %s1305_s1, %s1305_s1, %s1306_s15  }
   0xe   :  { %s54_s18 = sshll.u32 %s1415_s3, 4  ;;  %s1307_s19 = smov [#allocation4]   ;;  %s55_s18 = int_to_ptr.hbm [resolvable:$true] %s54_s18 }
   0xf   :  { %s31_s20 = sshll.u32 %s1307_s19, 4  ;;  %s1308_s5 = smov [#allocation9]   ;;  %s32_s20 = int_to_ptr.vmem [resolvable:$true] %s31_s20 }
  0x10   :  { %34 = dma.hbm_to_vmem [thread:$0]  %s30_s14, 128, %s32_s20, [#allocation5]  }
  0x11   :  { %s56_s21 = sshll.u32 %s1308_s5, 4  ;;  %s87_s0 = sshll.u32 %s1420_s8, 4  ;;  %s57_s21 = int_to_ptr.vmem [resolvable:$true] %s56_s21  ;;  %s88_s0 = int_to_ptr.hbm [resolvable:$true] %s87_s0 }
  0x12   :  { %62 = dma.hbm_to_vmem [thread:$0]  %s55_s18, 4096, %s57_s21, [#allocation8], %s1305_s1, %s1305_s1, %s1306_s15  }
  0x13   :  { %s1309_s24 = smov [#allocation12]  }
  0x14   :  { %s89_s25 = sshll.u32 %s1309_s24, 4  ;;  %s90_s25 = int_to_ptr.vmem [resolvable:$true] %s89_s25 }
  0x15   :  { %92 = dma.hbm_to_vmem [thread:$0]  %s88_s0, 32, %s90_s25, [#allocation11]  }
  0x16   :  { %1293 = dma.done.wait [#allocation5], 128  }
  0x17   :  { %1294 = vsyncadd [#allocation5], 4294967168 }
  0x18   :  { %1295 = dma.done.wait [#allocation8], 4608  }
  0x19   :  { %1296 = vsyncadd [#allocation8], 4294962688 }
  0x1a   :  { %1297 = dma.done.wait [#allocation11], 4128  }
  0x1b   :  { %1298 = vsyncadd [#allocation11], 4294963168  ;;  %v792_v2 = vld [vmem:[#allocation7] sm:$0xf]  ;;  %v1068_v3 = vld [vmem:[#allocation7 + $0xc] sm:$0xf0] }
  0x1c   :  { %v1066_v4 = vld [vmem:[#allocation7 + $0x4] sm:$0xf]  ;;  %v793_v5 = vor.u32 %v1068_v3, %v792_v2  ;;  %v794_v6 = vld [vmem:[#allocation7 + $0x10] sm:$0xf0]  ;;  %v800_v7 = vld [vmem:[#allocation7 + $0x8] sm:$0xf] }
  0x1d   :  { %v1069_v8 = vld [vmem:[#allocation7 + $0x14] sm:$0xf0]  ;;  %v797_v9 = vor.u32 %v1066_v4, %v794_v6  ;;  %vm154_vm0 = vcmask 130048   ;;  %v1067_v12 = vld [vmem:[#allocation7 + $0xc] sm:$0xf]  ;;  %s778_s30 = sshll.u32 %s1422_s11, 4  ;;  %s779_s30 = int_to_ptr.hbm [resolvable:$true] %s778_s30 }
  0x1e   :  { %v801_v10 = vor.u32 %v1069_v8, %v800_v7  ;;  %v118_v11 = vld [vmem:[#allocation4] sm:$0xff]  ;;  %165 = vmatpush.bf16.msra.mxu0 %v793_v5  ;;  %v868_v16 = vld [vmem:[#allocation9 + $0x70] sm:$0xf]  ;;  %v1084_v21 = vld [vmem:[#allocation9 + $0x74] sm:$0xf] }
  0x1f   :  { %v802_v13 = vld [vmem:[#allocation7 + $0x18] sm:$0xf0]  ;;  %v119_v14 = vpack.c.bf16 %v118_v11, %v118_v11  ;;  %v1085_v17 = vld [vmem:[#allocation9 + $0x74] sm:$0xf0]  ;;  %v932_v18 = vld [vmem:[#allocation9 + $0xf0] sm:$0xf]  ;;  %178 = vmatpush.bf16.msra.mxu1 %v797_v9 }
  0x20   :  { %v805_v15 = vor.u32 %v1067_v12, %v802_v13  ;;  %191 = vmatpush.bf16.msra.mxu2 %v801_v10  ;;  %v869_v19 = vor.u32 %v1085_v17, %v868_v16  ;;  %v1101_v20 = vld [vmem:[#allocation9 + $0xf4] sm:$0xf0]  ;;  %v870_v22 = vld [vmem:[#allocation9 + $0x78] sm:$0xf0]  ;;  %v1100_v25 = vld [vmem:[#allocation9 + $0xf4] sm:$0xf] }
  0x21   :  { %v933_v23 = vor.u32 %v1101_v20, %v932_v18  ;;  %v873_v24 = vor.u32 %v1084_v21, %v870_v22  ;;  %v934_v26 = vld [vmem:[#allocation9 + $0xf8] sm:$0xf0]  ;;  %v860_v27 = vld [vmem:[#allocation9 + $0x60] sm:$0xf]  ;;  %806 = vmatmul.msk.bf16.vlgmr.msra.gmra.mxu0 %vm154_vm0, %v119_v14  ;;  %v1083_v29 = vld [vmem:[#allocation9 + $0x64] sm:$0xf0] }
  0x22   :  { %204 = vmatpush.bf16.msra.mxu3 %v805_v15  ;;  %v937_v28 = vor.u32 %v1100_v25, %v934_v26  ;;  %v924_v30 = vld [vmem:[#allocation9 + $0xe0] sm:$0xf]  ;;  %v1099_v31 = vld [vmem:[#allocation9 + $0xe4] sm:$0xf0]  ;;  %807 = vmatmul.msk.bf16.vlgmr.msra.gmra.mxu1 %vm154_vm0, %v119_v14  ;;  %v1082_v32 = vld [vmem:[#allocation9 + $0x64] sm:$0xf]  ;;  %v861_v35 = vor.u32 %v1083_v29, %v860_v27 }
  0x23   :  { %808 = vmatmul.msk.bf16.vlgmr.msra.gmra.mxu2 %vm154_vm0, %v119_v14  ;;  %v862_v33 = vld [vmem:[#allocation9 + $0x68] sm:$0xf0]  ;;  %v1098_v34 = vld [vmem:[#allocation9 + $0xe4] sm:$0xf]  ;;  %414 = vmatpush.bf16.msrb.mxu0 %v869_v19  ;;  %v925_v37 = vor.u32 %v1099_v31, %v924_v30  ;;  %v852_v39 = vld [vmem:[#allocation9 + $0x50] sm:$0xf] }
  0x24   :  { %v926_v36 = vld [vmem:[#allocation9 + $0xe8] sm:$0xf0]  ;;  %427 = vmatpush.bf16.msrb.mxu1 %v933_v23  ;;  %440 = vmatpush.bf16.msrb.mxu2 %v873_v24  ;;  %v865_v38 = vor.u32 %v1082_v32, %v862_v33  ;;  %v1081_v40 = vld [vmem:[#allocation9 + $0x54] sm:$0xf0]  ;;  %v916_v41 = vld [vmem:[#allocation9 + $0xd0] sm:$0xf] }
  0x25   :  { %809 = vmatmul.msk.bf16.vlgmr.msra.gmra.mxu3 %vm154_vm0, %v119_v14  ;;  %v929_v42 = vor.u32 %v1098_v34, %v926_v36  ;;  %v1097_v43 = vld [vmem:[#allocation9 + $0xd4] sm:$0xf0]  ;;  %v1080_v44 = vld [vmem:[#allocation9 + $0x54] sm:$0xf]  ;;  %v854_v45 = vld [vmem:[#allocation9 + $0x58] sm:$0xf0]  ;;  %v853_v48 = vor.u32 %v1081_v40, %v852_v39 }
  0x26   :  { %453 = vmatpush.bf16.msrb.mxu3 %v937_v28  ;;  %v1096_v46 = vld [vmem:[#allocation9 + $0xd4] sm:$0xf]  ;;  %v918_v47 = vld [vmem:[#allocation9 + $0xd8] sm:$0xf0]  ;;  %v917_v49 = vor.u32 %v1097_v43, %v916_v41  ;;  %v857_v50 = vor.u32 %v1080_v44, %v854_v45  ;;  %v844_v51 = vld [vmem:[#allocation9 + $0x40] sm:$0xf] }
  0x27   :  { %415 = vmatpush.bf16.msrb.mxu0 %v861_v35  ;;  %v1079_v52 = vld [vmem:[#allocation9 + $0x44] sm:$0xf0]  ;;  %v908_v53 = vld [vmem:[#allocation9 + $0xc0] sm:$0xf]  ;;  %v921_v54 = vor.u32 %v1096_v46, %v918_v47  ;;  %v1078_v56 = vld [vmem:[#allocation9 + $0x44] sm:$0xf] }
  0x28   :  { %428 = vmatpush.bf16.msrb.mxu1 %v925_v37  ;;  %441 = vmatpush.bf16.msrb.mxu2 %v865_v38  ;;  %v1095_v55 = vld [vmem:[#allocation9 + $0xc4] sm:$0xf0]  ;;  %v846_v57 = vld [vmem:[#allocation9 + $0x48] sm:$0xf0]  ;;  %v1094_v58 = vld [vmem:[#allocation9 + $0xc4] sm:$0xf]  ;;  %v845_v60 = vor.u32 %v1079_v52, %v844_v51 }
  0x29   :  { %v910_v59 = vld [vmem:[#allocation9 + $0xc8] sm:$0xf0]  ;;  %v909_v61 = vor.u32 %v1095_v55, %v908_v53  ;;  %v849_v62 = vor.u32 %v1078_v56, %v846_v57  ;;  %v836_v63 = vld [vmem:[#allocation9 + $0x30] sm:$0xf]  ;;  %v1077_v0 = vld [vmem:[#allocation9 + $0x34] sm:$0xf0] }
  0x2a   :  { %454 = vmatpush.bf16.msrb.mxu3 %v929_v42  ;;  %v900_v1 = vld [vmem:[#allocation9 + $0xb0] sm:$0xf]  ;;  %v913_v2 = vor.u32 %v1094_v58, %v910_v59  ;;  %v1093_v3 = vld [vmem:[#allocation9 + $0xb4] sm:$0xf0]  ;;  %v1076_v4 = vld [vmem:[#allocation9 + $0x34] sm:$0xf]  ;;  %v837_v8 = vor.u32 %v1077_v0, %v836_v63 }
  0x2b   :  { %416 = vmatpush.bf16.msrb.mxu0 %v853_v48  ;;  %v838_v5 = vld [vmem:[#allocation9 + $0x38] sm:$0xf0]  ;;  %v1092_v6 = vld [vmem:[#allocation9 + $0xb4] sm:$0xf]  ;;  %v901_v9 = vor.u32 %v1093_v3, %v900_v1  ;;  %v828_v11 = vld [vmem:[#allocation9 + $0x20] sm:$0xf] }
  0x2c   :  { %429 = vmatpush.bf16.msrb.mxu1 %v917_v49  ;;  %442 = vmatpush.bf16.msrb.mxu2 %v857_v50  ;;  %v902_v7 = vld [vmem:[#allocation9 + $0xb8] sm:$0xf0]  ;;  %v841_v10 = vor.u32 %v1076_v4, %v838_v5  ;;  %v1075_v12 = vld [vmem:[#allocation9 + $0x24] sm:$0xf0]  ;;  %v892_v13 = vld [vmem:[#allocation9 + $0xa0] sm:$0xf] }
  0x2d   :  { %v905_v14 = vor.u32 %v1092_v6, %v902_v7  ;;  %v1091_v15 = vld [vmem:[#allocation9 + $0xa4] sm:$0xf0]  ;;  %v1074_v16 = vld [vmem:[#allocation9 + $0x24] sm:$0xf]  ;;  %v830_v17 = vld [vmem:[#allocation9 + $0x28] sm:$0xf0]  ;;  %v829_v20 = vor.u32 %v1075_v12, %v828_v11 }
  0x2e   :  { %455 = vmatpush.bf16.msrb.mxu3 %v921_v54  ;;  %v1090_v18 = vld [vmem:[#allocation9 + $0xa4] sm:$0xf]  ;;  %v894_v19 = vld [vmem:[#allocation9 + $0xa8] sm:$0xf0]  ;;  %v893_v21 = vor.u32 %v1091_v15, %v892_v13  ;;  %v833_v22 = vor.u32 %v1074_v16, %v830_v17  ;;  %v820_v23 = vld [vmem:[#allocation9 + $0x10] sm:$0xf] }
  0x2f   :  { %417 = vmatpush.bf16.msrb.mxu0 %v845_v60  ;;  %v1073_v24 = vld [vmem:[#allocation9 + $0x14] sm:$0xf0]  ;;  %v884_v25 = vld [vmem:[#allocation9 + $0x90] sm:$0xf]  ;;  %v897_v26 = vor.u32 %v1090_v18, %v894_v19  ;;  %v1072_v28 = vld [vmem:[#allocation9 + $0x14] sm:$0xf] }
  0x30   :  { %430 = vmatpush.bf16.msrb.mxu1 %v909_v61  ;;  %443 = vmatpush.bf16.msrb.mxu2 %v849_v62  ;;  %v1089_v27 = vld [vmem:[#allocation9 + $0x94] sm:$0xf0]  ;;  %v822_v29 = vld [vmem:[#allocation9 + $0x18] sm:$0xf0]  ;;  %v1088_v30 = vld [vmem:[#allocation9 + $0x94] sm:$0xf]  ;;  %v821_v33 = vor.u32 %v1073_v24, %v820_v23 }
  0x31   :  { %v886_v31 = vld [vmem:[#allocation9 + $0x98] sm:$0xf0]  ;;  %v812_v32 = vld [vmem:[#allocation9] sm:$0xf]  ;;  %v1071_v34 = vld [vmem:[#allocation9 + $0x4] sm:$0xf0]  ;;  %v885_v37 = vor.u32 %v1089_v27, %v884_v25  ;;  %v825_v38 = vor.u32 %v1072_v28, %v822_v29 }
  0x32   :  { %456 = vmatpush.bf16.msrb.mxu3 %v913_v2  ;;  %v876_v35 = vld [vmem:[#allocation9 + $0x80] sm:$0xf]  ;;  %v1087_v36 = vld [vmem:[#allocation9 + $0x84] sm:$0xf0]  ;;  %v1070_v39 = vld [vmem:[#allocation9 + $0x4] sm:$0xf]  ;;  %v889_v42 = vor.u32 %v1088_v30, %v886_v31  ;;  %v813_v47 = vor.u32 %v1071_v34, %v812_v32 }
  0x33   :  { %418 = vmatpush.bf16.msrb.mxu0 %v837_v8  ;;  %v814_v40 = vld [vmem:[#allocation9 + $0x8] sm:$0xf0]  ;;  %v1086_v41 = vld [vmem:[#allocation9 + $0x84] sm:$0xf]  ;;  %v996_v44 = vld [vmem:[#allocation10 + $0x70] sm:$0xf]  ;;  %v877_v51 = vor.u32 %v1087_v36, %v876_v35 }
  0x34   :  { %431 = vmatpush.bf16.msrb.mxu1 %v901_v9  ;;  %444 = vmatpush.bf16.msrb.mxu2 %v841_v10  ;;  %v878_v43 = vld [vmem:[#allocation9 + $0x88] sm:$0xf0]  ;;  %v1117_v45 = vld [vmem:[#allocation10 + $0x74] sm:$0xf0]  ;;  %v1060_v46 = vld [vmem:[#allocation10 + $0xf0] sm:$0xf]  ;;  %v817_v52 = vor.u32 %v1070_v39, %v814_v40 }
  0x35   :  { %v1133_v48 = vld [vmem:[#allocation10 + $0xf4] sm:$0xf0]  ;;  %v1116_v49 = vld [vmem:[#allocation10 + $0x74] sm:$0xf]  ;;  %v998_v50 = vld [vmem:[#allocation10 + $0x78] sm:$0xf0]  ;;  %v881_v55 = vor.u32 %v1086_v41, %v878_v43  ;;  %v997_v56 = vor.u32 %v1117_v45, %v996_v44 }
  0x36   :  { %457 = vmatpush.bf16.msrb.mxu3 %v905_v14  ;;  %v1132_v53 = vld [vmem:[#allocation10 + $0xf4] sm:$0xf]  ;;  %v1062_v54 = vld [vmem:[#allocation10 + $0xf8] sm:$0xf0]  ;;  %v1061_v57 = vor.u32 %v1133_v48, %v1060_v46  ;;  %v1001_v58 = vor.u32 %v1116_v49, %v998_v50  ;;  %v988_v59 = vld [vmem:[#allocation10 + $0x60] sm:$0xf] }
  0x37   :  { %419 = vmatpush.bf16.msrb.mxu0 %v829_v20  ;;  %v1115_v60 = vld [vmem:[#allocation10 + $0x64] sm:$0xf0]  ;;  %v1052_v61 = vld [vmem:[#allocation10 + $0xe0] sm:$0xf]  ;;  %v1065_v62 = vor.u32 %v1132_v53, %v1062_v54  ;;  %v1114_v0 = vld [vmem:[#allocation10 + $0x64] sm:$0xf] }
  0x38   :  { %432 = vmatpush.bf16.msrb.mxu1 %v893_v21  ;;  %445 = vmatpush.bf16.msrb.mxu2 %v833_v22  ;;  %v1131_v63 = vld [vmem:[#allocation10 + $0xe4] sm:$0xf0]  ;;  %v990_v1 = vld [vmem:[#allocation10 + $0x68] sm:$0xf0]  ;;  %v1130_v2 = vld [vmem:[#allocation10 + $0xe4] sm:$0xf]  ;;  %v989_v4 = vor.u32 %v1115_v60, %v988_v59 }
  0x39   :  { %v1054_v3 = vld [vmem:[#allocation10 + $0xe8] sm:$0xf0]  ;;  %v1053_v5 = vor.u32 %v1131_v63, %v1052_v61  ;;  %v993_v6 = vor.u32 %v1114_v0, %v990_v1  ;;  %v980_v8 = vld [vmem:[#allocation10 + $0x50] sm:$0xf]  ;;  %v1113_v9 = vld [vmem:[#allocation10 + $0x54] sm:$0xf0] }
  0x3a   :  { %458 = vmatpush.bf16.msrb.mxu3 %v897_v26  ;;  %v1057_v7 = vor.u32 %v1130_v2, %v1054_v3  ;;  %v1044_v10 = vld [vmem:[#allocation10 + $0xd0] sm:$0xf]  ;;  %v981_v11 = vor.u32 %v1113_v9, %v980_v8  ;;  %v1129_v12 = vld [vmem:[#allocation10 + $0xd4] sm:$0xf0]  ;;  %v1112_v13 = vld [vmem:[#allocation10 + $0x54] sm:$0xf] }
  0x3b   :  { %420 = vmatpush.bf16.msrb.mxu0 %v821_v33  ;;  %v982_v14 = vld [vmem:[#allocation10 + $0x58] sm:$0xf0]  ;;  %v1045_v15 = vor.u32 %v1129_v12, %v1044_v10  ;;  %v1128_v17 = vld [vmem:[#allocation10 + $0xd4] sm:$0xf]  ;;  %v972_v20 = vld [vmem:[#allocation10 + $0x40] sm:$0xf] }
  0x3c   :  { %433 = vmatpush.bf16.msrb.mxu1 %v885_v37  ;;  %446 = vmatpush.bf16.msrb.mxu2 %v825_v38  ;;  %v985_v16 = vor.u32 %v1112_v13, %v982_v14  ;;  %v1046_v18 = vld [vmem:[#allocation10 + $0xd8] sm:$0xf0]  ;;  %v1111_v21 = vld [vmem:[#allocation10 + $0x44] sm:$0xf0]  ;;  %v1036_v22 = vld [vmem:[#allocation10 + $0xc0] sm:$0xf] }
  0x3d   :  { %v1049_v19 = vor.u32 %v1128_v17, %v1046_v18  ;;  %v973_v23 = vor.u32 %v1111_v21, %v972_v20  ;;  %v1127_v24 = vld [vmem:[#allocation10 + $0xc4] sm:$0xf0]  ;;  %v1110_v25 = vld [vmem:[#allocation10 + $0x44] sm:$0xf]  ;;  %v974_v26 = vld [vmem:[#allocation10 + $0x48] sm:$0xf0] }
  0x3e   :  { %459 = vmatpush.bf16.msrb.mxu3 %v889_v42  ;;  %v1037_v27 = vor.u32 %v1127_v24, %v1036_v22  ;;  %v977_v28 = vor.u32 %v1110_v25, %v974_v26  ;;  %v1126_v29 = vld [vmem:[#allocation10 + $0xc4] sm:$0xf]  ;;  %v1038_v30 = vld [vmem:[#allocation10 + $0xc8] sm:$0xf0]  ;;  %v964_v32 = vld [vmem:[#allocation10 + $0x30] sm:$0xf] }
  0x3f   :  { %421 = vmatpush.bf16.msrb.mxu0 %v813_v47  ;;  %v1041_v31 = vor.u32 %v1126_v29, %v1038_v30  ;;  %v1109_v33 = vld [vmem:[#allocation10 + $0x34] sm:$0xf0]  ;;  %v1028_v34 = vld [vmem:[#allocation10 + $0xb0] sm:$0xf]  ;;  %v1108_v37 = vld [vmem:[#allocation10 + $0x34] sm:$0xf] }
  0x40   :  { %434 = vmatpush.bf16.msrb.mxu1 %v877_v51  ;;  %447 = vmatpush.bf16.msrb.mxu2 %v817_v52  ;;  %v965_v35 = vor.u32 %v1109_v33, %v964_v32  ;;  %v1125_v36 = vld [vmem:[#allocation10 + $0xb4] sm:$0xf0]  ;;  %v966_v38 = vld [vmem:[#allocation10 + $0x38] sm:$0xf0]  ;;  %v1124_v41 = vld [vmem:[#allocation10 + $0xb4] sm:$0xf] }
  0x41   :  { %v1029_v39 = vor.u32 %v1125_v36, %v1028_v34  ;;  %v969_v40 = vor.u32 %v1108_v37, %v966_v38  ;;  %v1030_v42 = vld [vmem:[#allocation10 + $0xb8] sm:$0xf0]  ;;  %v956_v44 = vld [vmem:[#allocation10 + $0x20] sm:$0xf]  ;;  %v1107_v45 = vld [vmem:[#allocation10 + $0x24] sm:$0xf0] }
  0x42   :  { %460 = vmatpush.bf16.msrb.mxu3 %v881_v55  ;;  %v1033_v43 = vor.u32 %v1124_v41, %v1030_v42  ;;  %v1020_v46 = vld [vmem:[#allocation10 + $0xa0] sm:$0xf]  ;;  %v957_v47 = vor.u32 %v1107_v45, %v956_v44  ;;  %v1123_v48 = vld [vmem:[#allocation10 + $0xa4] sm:$0xf0]  ;;  %v1106_v49 = vld [vmem:[#allocation10 + $0x24] sm:$0xf] }
  0x43   :  { %668 = vmatpush.bf16.msra.mxu0 %v997_v56  ;;  %v958_v50 = vld [vmem:[#allocation10 + $0x28] sm:$0xf0]  ;;  %v1021_v51 = vor.u32 %v1123_v48, %v1020_v46  ;;  %v1122_v53 = vld [vmem:[#allocation10 + $0xa4] sm:$0xf]  ;;  %v948_v56 = vld [vmem:[#allocation10 + $0x10] sm:$0xf] }
  0x44   :  { %681 = vmatpush.bf16.msra.mxu1 %v1061_v57  ;;  %694 = vmatpush.bf16.msra.mxu2 %v1001_v58  ;;  %v961_v52 = vor.u32 %v1106_v49, %v958_v50  ;;  %v1022_v54 = vld [vmem:[#allocation10 + $0xa8] sm:$0xf0]  ;;  %v1105_v57 = vld [vmem:[#allocation10 + $0x14] sm:$0xf0]  ;;  %v1012_v58 = vld [vmem:[#allocation10 + $0x90] sm:$0xf] }
  0x45   :  { %v1025_v55 = vor.u32 %v1122_v53, %v1022_v54  ;;  %v949_v59 = vor.u32 %v1105_v57, %v948_v56  ;;  %v1121_v60 = vld [vmem:[#allocation10 + $0x94] sm:$0xf0]  ;;  %v1104_v61 = vld [vmem:[#allocation10 + $0x14] sm:$0xf]  ;;  %v1014_v2 = vld [vmem:[#allocation10 + $0x98] sm:$0xf0] }
  0x46   :  { %707 = vmatpush.bf16.msra.mxu3 %v1065_v62  ;;  %v950_v62 = vld [vmem:[#allocation10 + $0x18] sm:$0xf0]  ;;  %v1013_v63 = vor.u32 %v1121_v60, %v1012_v58  ;;  %v1120_v1 = vld [vmem:[#allocation10 + $0x94] sm:$0xf]  ;;  %v940_v3 = vld [vmem:[#allocation10] sm:$0xf] }
  0x47   :  { %669 = vmatpush.bf16.msra.mxu0 %v989_v4  ;;  %v953_v0 = vor.u32 %v1104_v61, %v950_v62  ;;  %v1017_v4 = vor.u32 %v1120_v1, %v1014_v2  ;;  %v1102_v10 = vld [vmem:[#allocation10 + $0x4] sm:$0xf]  ;;  %v1006_v14 = vld [vmem:[#allocation10 + $0x88] sm:$0xf0]  ;;  %v248_v54 = vld [vmem:[%s1416_s4] sm:$0x3] }
  0x48   :  { %682 = vmatpush.bf16.msra.mxu1 %v1053_v5  ;;  %695 = vmatpush.bf16.msra.mxu2 %v993_v6  ;;  %v1103_v5 = vld [vmem:[#allocation10 + $0x4] sm:$0xf0]  ;;  %v1004_v6 = vld [vmem:[#allocation10 + $0x80] sm:$0xf]  ;;  %v1118_v12 = vld [vmem:[#allocation10 + $0x84] sm:$0xf] }
  0x49   :  { %v941_v8 = vor.u32 %v1103_v5, %v940_v3  ;;  %v250_v57 = vperm.slane %v248_v54, 0 }
  0x4a   :  { %708 = vmatpush.bf16.msra.mxu3 %v1057_v7  ;;  %v1119_v7 = vld [vmem:[#allocation10 + $0x84] sm:$0xf0] }
  0x4b   :  { %670 = vmatpush.bf16.msra.mxu0 %v981_v11  ;;  %v1005_v9 = vor.u32 %v1119_v7, %v1004_v6  ;;  %v942_v11 = vld [vmem:[#allocation10 + $0x8] sm:$0xf0] }
  0x4c   :  { %683 = vmatpush.bf16.msra.mxu1 %v1045_v15  ;;  %696 = vmatpush.bf16.msra.mxu2 %v985_v16  ;;  %v945_v13 = vor.u32 %v1102_v10, %v942_v11  ;;  %v1009_v15 = vor.u32 %v1118_v12, %v1006_v14  ;;  %v124_v16 = vld [vmem:[%s1414_s2] sm:$0xf] }
  0x4d   :  { %v126_v17 = vperm.slane %v124_v16, 0  ;;  %v127_v18 = vperm.slane %v124_v16, 1  ;;  %v129_v30 = vperm.slane %v124_v16, 3  ;;  %v722_v12 = vld [vmem:[%s1419_s7] sm:$0x3]  ;;  %s1311_s7 = smov [#allocation13]  }
  0x4e   :  { %709 = vmatpush.bf16.msra.mxu3 %v1049_v19  ;;  %s776_s28 = sshll.u32 %s1311_s7, 4  ;;  %s777_s28 = int_to_ptr.vmem [resolvable:$true] %s776_s28 }
  0x4f   :  { %671 = vmatpush.bf16.msra.mxu0 %v973_v23 }
  0x50   :  { %684 = vmatpush.bf16.msra.mxu1 %v1037_v27  ;;  %697 = vmatpush.bf16.msra.mxu2 %v977_v28  ;;  %v128_v27 = vperm.slane %v124_v16, 2 }
  0x52   :  { %710 = vmatpush.bf16.msra.mxu3 %v1041_v31 }
  0x53   :  { %672 = vmatpush.bf16.msra.mxu0 %v965_v35 }
  0x54   :  { %685 = vmatpush.bf16.msra.mxu1 %v1029_v39  ;;  %698 = vmatpush.bf16.msra.mxu2 %v969_v40 }
  0x56   :  { %711 = vmatpush.bf16.msra.mxu3 %v1033_v43 }
  0x57   :  { %673 = vmatpush.bf16.msra.mxu0 %v957_v47  ;;  %v502_v47 = vld [vmem:[%s1418_s6] sm:$0x3] }
  0x58   :  { %686 = vmatpush.bf16.msra.mxu1 %v1021_v51  ;;  %699 = vmatpush.bf16.msra.mxu2 %v961_v52  ;;  %v504_v48 = vperm.slane %v502_v47, 0  ;;  %v505_v56 = vperm.slane %v502_v47, 1 }
  0x5a   :  { %712 = vmatpush.bf16.msra.mxu3 %v1025_v55  ;;  %v251_v55 = vperm.slane %v248_v54, 1 }
  0x5b   :  { %674 = vmatpush.bf16.msra.mxu0 %v949_v59  ;;  %v738_v59 = vld [vmem:[#allocation12] sm:$0x3] }
  0x5c   :  { %687 = vmatpush.bf16.msra.mxu1 %v1013_v63  ;;  %700 = vmatpush.bf16.msra.mxu2 %v953_v0  ;;  %v740_v1 = vperm.slane %v738_v59, 0  ;;  %v741_v6 = vperm.slane %v738_v59, 1 }
  0x5e   :  { %713 = vmatpush.bf16.msra.mxu3 %v1017_v4 }
  0x5f   :  { %675 = vmatpush.bf16.msra.mxu0 %v941_v8 }
  0x60   :  { %688 = vmatpush.bf16.msra.mxu1 %v1005_v9  ;;  %701 = vmatpush.bf16.msra.mxu2 %v945_v13 }
  0x62   :  { %714 = vmatpush.bf16.msra.mxu3 %v1009_v15  ;;  %v725_v15 = vperm.slane %v722_v12, 1 }
  0x9e   :  { %v167_v19 = vpop.f32.mrf.mxu0 }
  0x9f   :  { %v168_v20 = vadd.f32 %v167_v19, %v126_v17  ;;  %v180_v21 = vpop.f32.mrf.mxu1  ;;  %v724_v19 = vperm.slane %v722_v12, 0 }
  0xa0   :  { %v181_v22 = vadd.f32 %v180_v21, %v127_v18 }
  0xa1   :  { %v210_v23 = vmax.f32 %v168_v20, 0.0 }
  0xa2   :  { %v211_v24 = vmax.f32 %v181_v22, 0.0 }
  0xa3   :  { %v214_v25 = vpack.c.bf16 %v210_v23, %v210_v23  ;;  %v1310_v23 = vmov 0  }
  0xa4   :  { %v215_v26 = vpack.c.bf16 %v211_v24, %v211_v24  ;;  %1145 = vset.pattern.permute.xlu1 %v1310_v23  ;;  %1146 = vset.pattern.permute.xlu0 %v1310_v23  ;;  %v1147_v24 = vld [vmem:[#allocation3] ss:$0 sm:$0xff] }
  0xa5   :  { %422 = vmatmul.bf16.vlgmr.msrb.gmra.mxu0 %v214_v25  ;;  %448 = vmatmul.bf16.vlgmr.msrb.gmra.mxu2 %v214_v25 }
  0xa6   :  { %v193_v28 = vpop.f32.mrf.mxu2  ;;  %435 = vmatmul.bf16.vlgmr.msrb.gmra.mxu1 %v215_v26  ;;  %461 = vmatmul.bf16.vlgmr.msrb.gmra.mxu3 %v215_v26  ;;  %v169_v29 = vpop.f32.mrf.mxu0 }
  0xa7   :  { %v182_v32 = vpop.f32.mrf.mxu1  ;;  %v194_v33 = vadd.f32 %v193_v28, %v128_v27  ;;  %v1148_v27 = vld [vmem:[#allocation2] ss:$0 sm:$0xff] }
  0xa8   :  { %v206_v31 = vpop.f32.mrf.mxu3 }
  0xa9   :  { %v207_v34 = vadd.f32 %v206_v31, %v129_v30  ;;  %v212_v35 = vmax.f32 %v194_v33, 0.0  ;;  %v754_v30 = vlaneseq }
  0xab   :  { %v213_v37 = vmax.f32 %v207_v34, 0.0  ;;  %v468_v39 = vpack.c.bf16 %v212_v35, %v212_v35  ;;  %v755_v32 = vand.u32 127, %v754_v30 }
  0xad   :  { %v469_v40 = vpack.c.bf16 %v213_v37, %v213_v37  ;;  %vm757_vm1 = vcmp.eq.s32.totalorder %v755_v32, 1  ;;  %vm756_vm2 = vcmp.eq.s32.totalorder %v755_v32, 0 }
  0xae   :  { %v195_v36 = vpop.f32.mrf.mxu2 }
  0xb0   :  { %v208_v38 = vpop.f32.mrf.mxu3 }
  0xb5   :  { %676 = vmatmul.bf16.vlgmr.msra.gmra.mxu0 %v468_v39  ;;  %702 = vmatmul.bf16.vlgmr.msra.gmra.mxu2 %v468_v39 }
  0xb6   :  { %689 = vmatmul.bf16.vlgmr.msra.gmra.mxu1 %v469_v40  ;;  %715 = vmatmul.bf16.vlgmr.msra.gmra.mxu3 %v469_v40 }
 0x122   :  { %v423_v41 = vpop.f32.mrf.mxu0 }
 0x123   :  { %v436_v42 = vpop.f32.mrf.mxu1  ;;  %v424_v2 = vadd.f32 %v423_v41, %v250_v57 }
 0x125   :  { %v437_v9 = vadd.f32 %v436_v42, %v424_v2 }
 0x127   :  { %v466_v18 = vmax.f32 %v437_v9, 0.0 }
 0x128   :  { %v449_v43 = vpop.f32.mrf.mxu2 }
 0x129   :  { %v462_v44 = vpop.f32.mrf.mxu3  ;;  %v450_v61 = vadd.f32 %v449_v43, %v251_v55  ;;  %v728_v21 = vmul.f32 %v724_v19, %v466_v18 }
 0x12a   :  { %v425_v45 = vpop.f32.mrf.mxu0 }
 0x12b   :  { %v438_v46 = vpop.f32.mrf.mxu1  ;;  %v463_v7 = vadd.f32 %v462_v44, %v450_v61 }
 0x12d   :  { %v467_v14 = vmax.f32 %v463_v7, 0.0 }
 0x12f   :  { %v729_v20 = vmul.f32 %v725_v15, %v467_v14 }
 0x130   :  { %v451_v49 = vpop.f32.mrf.mxu2 }
 0x131   :  { %v464_v50 = vpop.f32.mrf.mxu3  ;;  %v730_v22 = vadd.f32 %v729_v20, %v728_v21 }
 0x132   :  { %v677_v51 = vpop.f32.mrf.mxu0 }
 0x133   :  { %v678_v52 = vadd.f32 %v677_v51, %v504_v48  ;;  %v690_v53 = vpop.f32.mrf.mxu1 }
 0x135   :  { %v691_v58 = vadd.f32 %v690_v53, %v678_v52 }
 0x137   :  { %v720_v3 = vmax.f32 %v691_v58, 0.0 }
 0x138   :  { %v703_v60 = vpop.f32.mrf.mxu2 }
 0x139   :  { %v704_v62 = vadd.f32 %v703_v60, %v505_v56  ;;  %v716_v63 = vpop.f32.mrf.mxu3  ;;  %v744_v10 = vmul.f32 %v740_v1, %v720_v3 }
 0x13a   :  { %v679_v0 = vpop.f32.mrf.mxu0 }
 0x13b   :  { %v717_v4 = vadd.f32 %v716_v63, %v704_v62  ;;  %v692_v5 = vpop.f32.mrf.mxu1 }
 0x13d   :  { %v721_v8 = vmax.f32 %v717_v4, 0.0 }
 0x13f   :  { %v745_v11 = vmul.f32 %v741_v6, %v721_v8 }
 0x140   :  { %v705_v13 = vpop.f32.mrf.mxu2 }
 0x141   :  { %v718_v16 = vpop.f32.mrf.mxu3  ;;  %v746_v17 = vadd.f32 %v745_v11, %v744_v10 }
 0x143   :  { %747 = vadd.xlane.f32.xlu0 %v746_v17 }
 0x14b   :  { %731 = vadd.xlane.f32.xlu0 %v730_v22 }
 0x1b6   :  { %v748_v25 = vpop.xlane.xlu0 %747 }
 0x1b7   :  { %v753_v26 = vadd.f32 %v1147_v24, %v748_v25 }
 0x1b9   :  { %760 = vperm.xlu1 %1145, %v753_v26  }
 0x1be   :  { %v732_v28 = vpop.xlane.xlu0 %731 }
 0x1bf   :  { %v737_v29 = vadd.f32 %v1148_v27, %v732_v28 }
 0x1c1   :  { %766 = vperm.xlu1 %1145, %v737_v29  }
 0x22b   :  { %v761_v31 = vpop.permute.xlu1 %760 }
 0x22c   :  { %v763_v33 = vsel %vm757_vm1, %v761_v31, 0.0 }
 0x233   :  { %v767_v34 = vpop.permute.xlu1 %766 }
 0x234   :  { %v769_v35 = vsel %vm756_vm2, %v767_v34, %v763_v33 }
 0x235   :  { %770 = vst [vmem:[#allocation13] sm:$0xff] %v769_v35 }
 0x236   :  { %781 = dma.vmem_to_hbm [thread:$0]  %s777_s28, 128, %s779_s30, [#allocation6]  }
 0x237   :  { %1299 = dma.done.wait [#allocation6], 128  }
 0x238   :  { %1300 = vsyncadd [#allocation6], 4294967168 }
 0x239   :  { %786 = vsyncpa [#allocation5], 1 }
 0x23a   :  { %787 = vsyncpa [#allocation8], 1 }
 0x23b   :  { %788 = vsyncpa [#allocation11], 1 }
 0x23c   :  { %789 = vsyncpa [#allocation6], 1 }

</bundles_post_ra>
